<compile_context>
chip_gen: v6e
topology: v6e:2x2x1
jax: 0.10.0
libtpu: 0.0.40
codegen_flags: <defaults>
</compile_context>

<pallas_src>
import functools

import jax
import jax.numpy as jnp
from jax import lax
from jax.experimental import pallas as pl
from jax.experimental.pallas import tpu as pltpu


def _masked_sf_loss_kernel(alpha_ref, res_ref, gt_ref, mask_ref, w_ref,
                           out_ref, num_acc, den_acc, *, beta, gamma, eps):
    h = pl.program_id(1)
    nh = pl.num_programs(1)

    @pl.when(h == 0)
    def _():
        num_acc[...] = jnp.zeros_like(num_acc)
        den_acc[...] = jnp.zeros_like(den_acc)

    res = res_ref[...].astype(jnp.float32)      # (TB, C, HWT)
    gt = gt_ref[...]                            # (TB, HWT) int32
    mask = mask_ref[...].astype(jnp.float32)    # (TB, HWT)
    alpha = alpha_ref[...]                      # (1, C, 1) f32

    tb, c, hwt = res.shape

    # One-hot over the channel (sublane) axis -> gather-free res[b,gt] / alpha[gt].
    class_ids = lax.broadcasted_iota(jnp.int32, (tb, c, hwt), 1)
    onehot = (gt[:, None, :] == class_ids).astype(jnp.float32)   # (TB, C, HWT)

    p_g = jnp.sum(res * onehot, axis=1)          # res[b, gt, hw]   (TB, HWT)
    alpha_g = jnp.sum(alpha * onehot, axis=1)    # alpha[gt]        (TB, HWT)

    # pt = exp(-(-log(p_g+eps))) is exactly p_g + eps: keep only the log on the EUP.
    pt = p_g + eps
    nll = -jnp.log(pt)
    om = jnp.maximum(1.0 - pt, 0.0)              # clamp: pt can exceed 1 by eps
    if gamma == 0.0:
        focal_mod = jnp.ones_like(om)
    elif gamma == 1.0:
        focal_mod = om
    elif gamma == 2.0:
        focal_mod = om * om
    elif gamma == 3.0:
        focal_mod = om * om * om
    else:
        focal_mod = jnp.power(om, gamma)
    focal_px = nll * mask * alpha_g * focal_mod  # (TB, HWT)

    # sum_c (res - onehot)^2 == sum_c res^2 - 2*res[gt] + 1 (onehot is 0/1, one 1/pixel):
    # avoids a (TB, C, HWT) diff temporary and a second channel reduction.
    sq = jnp.sum(res * res, axis=1)
    mse_px = (sq - 2.0 * p_g + 1.0) * mask       # (TB, HWT)

    num_acc[...] += (beta * jnp.sum(focal_px, axis=1, keepdims=True)
                     + jnp.sum(mse_px, axis=1, keepdims=True))
    den_acc[...] += jnp.sum(mask, axis=1, keepdims=True)

    @pl.when(h == nh - 1)
    def _():
        # Per-sample weighted loss; w carries 1/B for real rows, 0 for batch padding.
        out_ref[...] = num_acc[...] / den_acc[...] * w_ref[...]


def _ceil_div(a, b):
    return -(-a // b)


def _vmem_budget():
    """(working-set budget, scoped-vmem limit) in bytes, generation-aware."""
    cap = 64 * 1024 * 1024                       # conservative default (v7x physical)
    try:
        info = pltpu.get_tpu_info()
        cap = int(getattr(info, "vmem_capacity_bytes", cap))
    except Exception:
        pass
    budget = min(cap // 4, 24 * 1024 * 1024)     # v5e/v6e: 24 MiB; v7x: 16 MiB
    limit = min((cap * 3) // 4, 96 * 1024 * 1024)
    return budget, limit


def _choose_tiles(B, C, HW, res_isz, mask_isz, budget):
    """Pick (TB, HW_TILE) so the f32 working set (incl. double-buffered inputs) fits."""
    per_elem = C * (2 * res_isz + 12) + 2 * (4 + mask_isz) + 32
    elems = max(budget // per_elem, 8 * 128)

    min_tb = B if B < 8 else 8
    if min_tb * HW <= elems:
        hw_tile = HW                                   # whole spatial plane per sample
        tb = min(B, max(min_tb, (elems // HW) // 8 * 8))
        if tb < B:
            # Balance batch blocks so padding is minimized.
            nb = _ceil_div(B, tb)
            tb = min(tb, _ceil_div(_ceil_div(B, nb), 8) * 8)
        elif B >= 16:
            # Prefer >=2 batch blocks when it costs no padding: lets the "parallel"
            # batch axis shard across v7x's two TensorCores (free on v5e/v6e).
            for cand in range((B // 2) // 8 * 8, 7, -8):
                if B % cand == 0:
                    tb = cand
                    break
    else:
        tb = min_tb                                    # large image: tile the spatial axis
        hw_tile = max(128, (elems // tb) // 128 * 128)
        hw_tile = min(hw_tile, _ceil_div(HW, 128) * 128)
    return tb, hw_tile


def masked_sf_loss(res, gt, mask, alpha, *, beta=1.0, gamma=2.0, eps=1e-6):
    """Pallas implementation of MaskedSFLoss.forward. Returns a scalar."""
    B, C, H, W = res.shape
    assert gt.shape == (B, H, W) and mask.shape == (B, H, W)
    HW = H * W

    # Lane-dense layout, native dtypes streamed from HBM (f32 cast happens on the VPU).
    res2 = res.reshape(B, C, HW)
    gt2 = gt.reshape(B, HW).astype(jnp.int32)
    mask2 = mask.reshape(B, HW)
    alpha3 = jnp.asarray(alpha, jnp.float32).reshape(1, C, 1)

    budget, vmem_limit = _vmem_budget()
    TB, HWT = _choose_tiles(B, C, HW, res2.dtype.itemsize, mask2.dtype.itemsize, budget)

    Bp = _ceil_div(B, TB) * TB
    HWp = _ceil_div(HW, HWT) * HWT

    # Spatial padding: mask=0 -> padded pixels contribute exactly 0 to every sum.
    if HWp > HW:
        res2 = jnp.pad(res2, ((0, 0), (0, 0), (0, HWp - HW)))
        gt2 = jnp.pad(gt2, ((0, 0), (0, HWp - HW)))
        mask2 = jnp.pad(mask2, ((0, 0), (0, HWp - HW)))
    # Batch padding: mask=1 keeps den > 0 (finite sample loss); weight 0 removes it.
    if Bp > B:
        res2 = jnp.pad(res2, ((0, Bp - B), (0, 0), (0, 0)))
        gt2 = jnp.pad(gt2, ((0, Bp - B), (0, 0)))
        mask2 = jnp.pad(mask2, ((0, Bp - B), (0, 0)), constant_values=1)

    # Per-sample weight = 1/B for real samples, 0 for padding (trace-time constant).
    w = jnp.where(jnp.arange(Bp) < B, 1.0 / B, 0.0).astype(jnp.float32).reshape(Bp, 1)

    kernel = functools.partial(
        _masked_sf_loss_kernel,
        beta=float(beta), gamma=float(gamma), eps=float(eps),
    )

    n_trans = Bp * HWp * (1 if float(gamma) in (0.0, 1.0, 2.0, 3.0) else 3)
    cost = pl.CostEstimate(
        flops=int(Bp * HWp * (6 * C + 16)),
        transcendentals=int(n_trans),
        bytes_accessed=int(res2.size * res2.dtype.itemsize
                           + gt2.size * 4
                           + mask2.size * mask2.dtype.itemsize
                           + Bp * 8),
    )

    out = pl.pallas_call(
        kernel,
        out_shape=jax.ShapeDtypeStruct((Bp, 1), jnp.float32),
        grid_spec=pltpu.PrefetchScalarGridSpec(
            num_scalar_prefetch=0,
            grid=(Bp // TB, HWp // HWT),
            in_specs=[
                pl.BlockSpec((1, C, 1), lambda b, h: (0, 0, 0)),      # alpha
                pl.BlockSpec((TB, C, HWT), lambda b, h: (b, 0, h)),   # res
                pl.BlockSpec((TB, HWT), lambda b, h: (b, h)),         # gt
                pl.BlockSpec((TB, HWT), lambda b, h: (b, h)),         # mask
                pl.BlockSpec((TB, 1), lambda b, h: (b, 0)),           # per-sample weights
            ],
            out_specs=pl.BlockSpec((TB, 1), lambda b, h: (b, 0)),     # per-sample losses
            scratch_shapes=[pltpu.VMEM((TB, 1), jnp.float32),         # num accumulator
                            pltpu.VMEM((TB, 1), jnp.float32)],        # den accumulator
        ),
        compiler_params=pltpu.CompilerParams(
            # Batch blocks are independent (megacore-shardable on v7x); the spatial
            # axis carries the resident per-sample accumulators.
            dimension_semantics=("parallel", "arbitrary"),
            vmem_limit_bytes=int(vmem_limit),
        ),
        cost_estimate=cost,
    )(alpha3, res2, gt2, mask2, w)

    # Tiny (Bp,1) reduction outside the kernel; padded rows contribute exactly 0.
    return jnp.sum(out)


def _reference_loss(res, gt, mask, alpha, beta, gamma, eps):
    """Pure-JAX reference with the same semantics."""
    B, C, H, W = res.shape
    logp = jnp.log(res + eps)
    nll = -jnp.take_along_axis(logp, gt[:, None, :, :], axis=1)[:, 0]   # (B, H, W)
    pt = jnp.exp(-nll)
    alpha_g = jnp.asarray(alpha, jnp.float32)[gt]
    om = 1.0 - pt
    focal_mod = om * om if gamma == 2.0 else jnp.power(om, gamma)
    focal = nll * mask * alpha_g * focal_mod
    focal_sample = focal.sum(axis=(1, 2)) / mask.sum(axis=(1, 2))

    onehot = jax.nn.one_hot(gt, C, axis=1, dtype=res.dtype)             # (B, C, H, W)
    mse = (res - onehot) ** 2 * mask[:, None, :, :]
    mse_sample = mse.sum(axis=(1, 2, 3)) / mask.sum(axis=(1, 2))

    return beta * jnp.mean(focal_sample) + jnp.mean(mse_sample)


if __name__ == "__main__":
    key = jax.random.PRNGKey(0)
    k1, k2, k3 = jax.random.split(key, 3)

    B, C, H, W = 2, 4, 16, 16
    logits = jax.random.normal(k1, (B, C, H, W), dtype=jnp.float32)
    res = jax.nn.softmax(logits, axis=1)                     # class probabilities
    gt = jax.random.randint(k2, (B, H, W), 0, C, dtype=jnp.int32)
    mask = (jax.random.uniform(k3, (B, H, W)) > 0.5).astype(jnp.float32)
    mask = mask.at[:, 0, 0].set(1.0)                         # ensure mask.sum per sample > 0
    alpha = jnp.array([0.25, 0.5, 0.75, 1.0], dtype=jnp.float32)

    out = masked_sf_loss(res, gt, mask, alpha, beta=1.0, gamma=2.0, eps=1e-6)
    out = jax.block_until_ready(out)

    ref = _reference_loss(res, gt, mask, alpha, 1.0, 2.0, 1e-6)
    assert jnp.allclose(out, ref, rtol=1e-4, atol=1e-6), (out, ref)

    print("KERNEL_OK")
</pallas_src>

<mosaic_0001>
module attributes {stable_mosaic.version = 11 : i64} {
  func.func @_masked_sf_loss_kernel(%arg0: i32, %arg1: i32, %arg2: memref<1x4x1xf32, #tpu.memory_space<vmem>>, %arg3: memref<2x4x256xf32, #tpu.memory_space<vmem>>, %arg4: memref<2x256xi32, #tpu.memory_space<vmem>>, %arg5: memref<2x256xf32, #tpu.memory_space<vmem>>, %arg6: memref<2x1xf32, #tpu.memory_space<vmem>>, %arg7: memref<2x1xf32, #tpu.memory_space<vmem>>, %arg8: memref<2x1xf32, #tpu.memory_space<vmem>>, %arg9: memref<2x1xf32, #tpu.memory_space<vmem>>) attributes {dimension_semantics = [#tpu.dimension_semantics<parallel>, #tpu.dimension_semantics<arbitrary>], iteration_bounds = array<i64: 1, 1>, scalar_prefetch = 0 : i64, scratch_operands = 2 : i64, tpu.core_type = #tpu.core_type<tc>, window_params = [{pipeline_mode = #tpu.pipeline_mode<synchronous>, transform_indices = @transform_0, window_bounds = array<i64: 1, 4, 1>}, {transform_indices = @transform_1, window_bounds = array<i64: 2, 4, 256>}, {transform_indices = @transform_2, window_bounds = array<i64: 2, 256>}, {transform_indices = @transform_3, window_bounds = array<i64: 2, 256>}, {transform_indices = @transform_4, window_bounds = array<i64: 2, 1>}, {transform_indices = @transform_5, window_bounds = array<i64: 2, 1>}]} {
    %c0_i32 = arith.constant 0 : i32
    %0 = arith.cmpi eq, %arg1, %c0_i32 : i32
    %1 = arith.extui %0 : i1 to i32
    %c0_i32_0 = arith.constant 0 : i32
    %2 = arith.cmpi ne, %1, %c0_i32_0 : i32
    scf.if %2 {
      %cst_32 = arith.constant 0.000000e+00 : f32
      %57 = vector.broadcast %cst_32 : f32 to vector<2x1xf32>
      %c0_33 = arith.constant 0 : index
      %c0_34 = arith.constant 0 : index
      %58 = vector.load %arg8[%c0_33, %c0_34] : memref<2x1xf32, #tpu.memory_space<vmem>>, vector<2x1xf32>
      tpu.vector_store %arg8[%c0_33, %c0_34], %57 {strides = array<i32>} : memref<2x1xf32, #tpu.memory_space<vmem>>, vector<2x1xf32>,
      %cst_35 = arith.constant 0.000000e+00 : f32
      %59 = vector.broadcast %cst_35 : f32 to vector<2x1xf32>
      %c0_36 = arith.constant 0 : index
      %c0_37 = arith.constant 0 : index
      %60 = vector.load %arg9[%c0_36, %c0_37] : memref<2x1xf32, #tpu.memory_space<vmem>>, vector<2x1xf32>
      tpu.vector_store %arg9[%c0_36, %c0_37], %59 {strides = array<i32>} : memref<2x1xf32, #tpu.memory_space<vmem>>, vector<2x1xf32>,
    } else {
    }
    %c0 = arith.constant 0 : index
    %c0_1 = arith.constant 0 : index
    %c0_2 = arith.constant 0 : index
    %3 = vector.load %arg3[%c0, %c0_1, %c0_2] : memref<2x4x256xf32, #tpu.memory_space<vmem>>, vector<2x4x256xf32>
    %c0_3 = arith.constant 0 : index
    %c0_4 = arith.constant 0 : index
    %4 = vector.load %arg4[%c0_3, %c0_4] : memref<2x256xi32, #tpu.memory_space<vmem>>, vector<2x256xi32>
    %c0_5 = arith.constant 0 : index
    %c0_6 = arith.constant 0 : index
    %5 = vector.load %arg5[%c0_5, %c0_6] : memref<2x256xf32, #tpu.memory_space<vmem>>, vector<2x256xf32>
    %c0_7 = arith.constant 0 : index
    %c0_8 = arith.constant 0 : index
    %c0_9 = arith.constant 0 : index
    %6 = vector.load %arg2[%c0_7, %c0_8, %c0_9] : memref<1x4x1xf32, #tpu.memory_space<vmem>>, vector<1x4x1xf32>
    %7 = tpu.iota {dimensions = array<i32: 1>} : vector<2x4x256xi32>
    %8 = vector.shape_cast %4 : vector<2x256xi32> to vector<2x1x256xi32>
    %9 = vector.broadcast %8 : vector<2x1x256xi32> to vector<2x4x256xi32>
    %10 = arith.cmpi eq, %9, %7 : vector<2x4x256xi32>
    %11 = arith.extui %10 : vector<2x4x256xi1> to vector<2x4x256xi32>
    %12 = arith.sitofp %11 : vector<2x4x256xi32> to vector<2x4x256xf32>
    %13 = arith.mulf %3, %12 : vector<2x4x256xf32>
    %cst = arith.constant dense<0.000000e+00> : vector<2x256xf32>
    %14 = vector.multi_reduction <add>, %13, %cst [1] : vector<2x4x256xf32> to vector<2x256xf32>
    %15 = vector.broadcast %6 : vector<1x4x1xf32> to vector<2x4x256xf32>
    %16 = arith.mulf %15, %12 : vector<2x4x256xf32>
    %cst_10 = arith.constant dense<0.000000e+00> : vector<2x256xf32>
    %17 = vector.multi_reduction <add>, %16, %cst_10 [1] : vector<2x4x256xf32> to vector<2x256xf32>
    %cst_11 = arith.constant 9.99999997E-7 : f32
    %18 = vector.broadcast %cst_11 : f32 to vector<2x256xf32>
    %19 = arith.addf %14, %18 : vector<2x256xf32>
    %20 = math.log %19 : vector<2x256xf32>
    %cst_12 = arith.constant 0.000000e+00 : f32
    %21 = vector.broadcast %cst_12 : f32 to vector<2x256xf32>
    %22 = arith.subf %21, %20 : vector<2x256xf32>
    %cst_13 = arith.constant 1.000000e+00 : f32
    %23 = vector.broadcast %cst_13 : f32 to vector<2x256xf32>
    %24 = arith.subf %23, %19 : vector<2x256xf32>
    %cst_14 = arith.constant 0.000000e+00 : f32
    %25 = vector.broadcast %cst_14 : f32 to vector<2x256xf32>
    %26 = arith.maximumf %24, %25 : vector<2x256xf32>
    %27 = arith.mulf %26, %26 : vector<2x256xf32>
    %28 = arith.mulf %22, %5 : vector<2x256xf32>
    %29 = arith.mulf %28, %17 : vector<2x256xf32>
    %30 = arith.mulf %29, %27 : vector<2x256xf32>
    %31 = arith.mulf %3, %3 : vector<2x4x256xf32>
    %cst_15 = arith.constant dense<0.000000e+00> : vector<2x256xf32>
    %32 = vector.multi_reduction <add>, %31, %cst_15 [1] : vector<2x4x256xf32> to vector<2x256xf32>
    %cst_16 = arith.constant 2.000000e+00 : f32
    %33 = vector.broadcast %cst_16 : f32 to vector<2x256xf32>
    %34 = arith.mulf %33, %14 : vector<2x256xf32>
    %35 = arith.subf %32, %34 : vector<2x256xf32>
    %cst_17 = arith.constant 1.000000e+00 : f32
    %36 = vector.broadcast %cst_17 : f32 to vector<2x256xf32>
    %37 = arith.addf %35, %36 : vector<2x256xf32>
    %38 = arith.mulf %37, %5 : vector<2x256xf32>
    %c0_18 = arith.constant 0 : index
    %c0_19 = arith.constant 0 : index
    %39 = vector.load %arg8[%c0_18, %c0_19] : memref<2x1xf32, #tpu.memory_space<vmem>>, vector<2x1xf32>
    %cst_20 = arith.constant dense<0.000000e+00> : vector<2xf32>
    %40 = vector.multi_reduction <add>, %30, %cst_20 [1] : vector<2x256xf32> to vector<2xf32>
    %41 = vector.shape_cast %40 : vector<2xf32> to vector<2x1xf32>
    %cst_21 = arith.constant 1.000000e+00 : f32
    %42 = vector.broadcast %cst_21 : f32 to vector<2x1xf32>
    %43 = arith.mulf %42, %41 : vector<2x1xf32>
    %cst_22 = arith.constant dense<0.000000e+00> : vector<2xf32>
    %44 = vector.multi_reduction <add>, %38, %cst_22 [1] : vector<2x256xf32> to vector<2xf32>
    %45 = vector.shape_cast %44 : vector<2xf32> to vector<2x1xf32>
    %46 = arith.addf %43, %45 : vector<2x1xf32>
    %47 = arith.addf %39, %46 : vector<2x1xf32>
    %c0_23 = arith.constant 0 : index
    %c0_24 = arith.constant 0 : index
    %48 = vector.load %arg8[%c0_23, %c0_24] : memref<2x1xf32, #tpu.memory_space<vmem>>, vector<2x1xf32>
    tpu.vector_store %arg8[%c0_23, %c0_24], %47 {strides = array<i32>} : memref<2x1xf32, #tpu.memory_space<vmem>>, vector<2x1xf32>,
    %c0_25 = arith.constant 0 : index
    %c0_26 = arith.constant 0 : index
    %49 = vector.load %arg9[%c0_25, %c0_26] : memref<2x1xf32, #tpu.memory_space<vmem>>, vector<2x1xf32>
    %cst_27 = arith.constant dense<0.000000e+00> : vector<2xf32>
    %50 = vector.multi_reduction <add>, %5, %cst_27 [1] : vector<2x256xf32> to vector<2xf32>
    %51 = vector.shape_cast %50 : vector<2xf32> to vector<2x1xf32>
    %52 = arith.addf %49, %51 : vector<2x1xf32>
    %c0_28 = arith.constant 0 : index
    %c0_29 = arith.constant 0 : index
    %53 = vector.load %arg9[%c0_28, %c0_29] : memref<2x1xf32, #tpu.memory_space<vmem>>, vector<2x1xf32>
    tpu.vector_store %arg9[%c0_28, %c0_29], %52 {strides = array<i32>} : memref<2x1xf32, #tpu.memory_space<vmem>>, vector<2x1xf32>,
    %c0_i32_30 = arith.constant 0 : i32
    %54 = arith.cmpi eq, %arg1, %c0_i32_30 : i32
    %55 = arith.extui %54 : i1 to i32
    %c0_i32_31 = arith.constant 0 : i32
    %56 = arith.cmpi ne, %55, %c0_i32_31 : i32
    scf.if %56 {
      %c0_32 = arith.constant 0 : index
      %c0_33 = arith.constant 0 : index
      %57 = vector.load %arg8[%c0_32, %c0_33] : memref<2x1xf32, #tpu.memory_space<vmem>>, vector<2x1xf32>
      %c0_34 = arith.constant 0 : index
      %c0_35 = arith.constant 0 : index
      %58 = vector.load %arg9[%c0_34, %c0_35] : memref<2x1xf32, #tpu.memory_space<vmem>>, vector<2x1xf32>
      %59 = arith.divf %57, %58 : vector<2x1xf32>
      %c0_36 = arith.constant 0 : index
      %c0_37 = arith.constant 0 : index
      %60 = vector.load %arg6[%c0_36, %c0_37] : memref<2x1xf32, #tpu.memory_space<vmem>>, vector<2x1xf32>
      %61 = arith.mulf %59, %60 : vector<2x1xf32>
      %c0_38 = arith.constant 0 : index
      %c0_39 = arith.constant 0 : index
      %62 = vector.load %arg7[%c0_38, %c0_39] : memref<2x1xf32, #tpu.memory_space<vmem>>, vector<2x1xf32>
      tpu.vector_store %arg7[%c0_38, %c0_39], %61 {strides = array<i32>} : memref<2x1xf32, #tpu.memory_space<vmem>>, vector<2x1xf32>,
    } else {
    }
    return
  }
  func.func @transform_0(%arg0: i32, %arg1: i32) -> (i32, i32, i32) {
    %c0_i32 = arith.constant 0 : i32
    %c0_i32_0 = arith.constant 0 : i32
    %c0_i32_1 = arith.constant 0 : i32
    %c0_i32_2 = arith.constant 0 : i32
    return %c0_i32, %c0_i32_0, %c0_i32_1 : i32, i32, i32
  }
  func.func @transform_1(%arg0: i32, %arg1: i32) -> (i32, i32, i32) {
    %c0_i32 = arith.constant 0 : i32
    %c0_i32_0 = arith.constant 0 : i32
    return %arg0, %c0_i32, %arg1 : i32, i32, i32
  }
  func.func @transform_2(%arg0: i32, %arg1: i32) -> (i32, i32) {
    %c0_i32 = arith.constant 0 : i32
    return %arg0, %arg1 : i32, i32
  }
  func.func @transform_3(%arg0: i32, %arg1: i32) -> (i32, i32) {
    %c0_i32 = arith.constant 0 : i32
    return %arg0, %arg1 : i32, i32
  }
  func.func @transform_4(%arg0: i32, %arg1: i32) -> (i32, i32) {
    %c0_i32 = arith.constant 0 : i32
    %c0_i32_0 = arith.constant 0 : i32
    return %arg0, %c0_i32 : i32, i32
  }
  func.func @transform_5(%arg0: i32, %arg1: i32) -> (i32, i32) {
    %c0_i32 = arith.constant 0 : i32
    %c0_i32_0 = arith.constant 0 : i32
    return %arg0, %c0_i32 : i32, i32
  }
}

</mosaic_0001>

<bundles_post_ra>
// kernel: tpu_custom_call.1
= control target key start
LH: loop header
LB: loop body
LE: loop exit
PB: predicated region body
PF: predicated region fallthrough
CT: control target
= control target key end

     0   :  { %10 = vsyncpa [#allocation5], 0  ;;  %s377_s18 = smov [#allocation4]   ;;  %s512_s0 = inlined_call_operand.vmem [shape: f32[1,4,1], index: 0, kind: input, shape index: {}]   ;;  %s513_s1 = inlined_call_operand.hbm [shape: f32[2,4,256], index: 1, kind: input, shape index: {}]   ;;  %s514_s2 = inlined_call_operand.vmem [shape: s32[2,256], index: 2, kind: input, shape index: {}]   ;;  %s515_s3 = inlined_call_operand.vmem [shape: f32[2,256], index: 3, kind: input, shape index: {}]   ;;  %s516_s4 = inlined_call_operand.vmem [shape: f32[2,1], index: 4, kind: input, shape index: {}]   ;;  %s517_s5 = inlined_call_operand.vmem [shape: f32[2,1], index: 5, kind: output, shape index: {}]  }
   0x1   :  { %s18_s19 = sshll.u32 %s377_s18, 4  ;;  %s19_s19 = int_to_ptr.vmem [resolvable:$true] %s18_s19 }
   0x2   :  { %s363_s20 = scalar_lea.vmem %s19_s19, 256  ;;  %p368_p1 = scmp.lt.s32.totalorder %s19_s19, %s19_s19 }
   0x3   :  { %p364_p0 = scmp.ne.s32.totalorder %s19_s19, %s363_s20  ;;  %p369_p2 = scmp.lt.s32.totalorder %s363_s20, %s363_s20 }
   0x5   :  { %p370_p3 = por %p369_p2, %p368_p1 }
   0x7   :  { %p371_p4 = pnand %p370_p3, %p364_p0 }
   0x9   :  { %374 = shalt.err (!%p371_p4)
}
   0xa   :  { %s378_s21 = smov 128   ;;  %s379_s22 = smov 8  }
   0xb   :  { %24 = dma.hbm_to_vmem [thread:$0]  %s513_s1, 256, %s19_s19, [#allocation5], %s378_s21, %s378_s21, %s379_s22  }
   0xc   :  { %375 = dma.done.wait [#allocation5], 256  }
   0xd   :  { %376 = vsyncadd [#allocation5], 4294967040  ;;  %v46_v0 = vlaneseq  ;;  %v380_v1 = vmov 0   ;;  %v45_v5 = vld [vmem:[%s512_s0] sm:$0xf]  ;;  %v41_v6 = vld [vmem:[#allocation4] sm:$0xff] }
   0xe   :  { %344 = vset.pattern.permute.xlu0 %v380_v1  ;;  %v42_v7 = vld [vmem:[#allocation4 + $0x8] sm:$0xff]  ;;  %v333_v8 = vld.sshfl [vmem:[%s514_s2] sm:$0x33 pattern:$0x75316420]  ;;  %v221_v9 = vmul.f32 %v41_v6, %v41_v6  ;;  %vm100_vm0 = vcmask 1043456  }
   0xf   :  { %v47_v2 = vshrl.u32 %v46_v0, 7  ;;  %131 = vperm.xlu0 %344, %v45_v5   ;;  %v222_v10 = vmul.f32 %v42_v7, %v42_v7  ;;  %v55_v11 = vcombine.high %v333_v8, %v333_v8  ;;  %v381_v20 = vmov 0.0  }
  0x10   :  { %v225_v14 = vcombine.high %v221_v9, %v221_v9  ;;  %v229_v16 = vsel %vm100_vm0, %v221_v9, 0.0  ;;  %vm285_vm5 = vcmask 1041408   ;;  %vm38_vm6 = vcmask 1024  }
  0x11   :  { %v58_v3 = vsub.s32 0, %v47_v2  ;;  %v62_v4 = vsub.s32 1, %v47_v2  ;;  %v226_v15 = vcombine.high %v222_v10, %v222_v10  ;;  %v243_v17 = vsel %vm100_vm0, %v222_v10, 0.0  ;;  %40 = vst.msk [vmem:[#allocation3] sm:$0x3] %vm38_vm6, %v381_v20 }
  0x12   :  { %v230_v23 = vrot.slane %v229_v16, 4  ;;  %v236_v25 = vsel %vm100_vm0, %v225_v14, 0.0  ;;  %v244_v28 = vrot.slane %v243_v17, 4  ;;  %39 = vst.msk [vmem:[#allocation2] sm:$0x3] %vm38_vm6, %v381_v20  ;;  %vm279_vm7 = vcmask 1041409  }
  0x13   :  { %v59_v12 = vrot.slane %v333_v8, %v58_v3  ;;  %v63_v13 = vrot.slane %v333_v8, %v62_v4  ;;  %v67_v18 = vrot.slane %v55_v11, %v58_v3  ;;  %v71_v19 = vrot.slane %v55_v11, %v62_v4  ;;  %v448_v3 = vld.sshfl [vmem:[%s515_s3] sm:$0x33 pattern:$0x76325410] }
  0x14   :  { %v250_v31 = vsel %vm100_vm0, %v226_v15, 0.0  ;;  %v231_v32 = vadd.f32 %v230_v23, %v229_v16  ;;  %v237_v33 = vrot.slane %v236_v25, 4  ;;  %v245_v34 = vadd.f32 %v244_v28, %v243_v17 }
  0x15   :  { %vm72_vm1 = vcmp.eq.s32.totalorder %v59_v12, %v47_v2  ;;  %vm73_vm2 = vcmp.eq.s32.totalorder %v63_v13, %v47_v2  ;;  %vm74_vm3 = vcmp.eq.s32.totalorder %v67_v18, %v47_v2  ;;  %vm75_vm4 = vcmp.eq.s32.totalorder %v71_v19, %v47_v2 }
  0x16   :  { %v424_v21 = vsel %vm72_vm1, 1.0, %v381_v20  ;;  %v427_v22 = vsel %vm73_vm2, 1.0, %v381_v20  ;;  %v433_v26 = vsel %vm74_vm3, 1.0, %v381_v20  ;;  %v436_v27 = vsel %vm75_vm4, 1.0, %v381_v20 }
  0x17   :  { %v88_v24 = vcombine.low %v424_v21, %v427_v22  ;;  %v89_v29 = vcombine.low %v433_v26, %v436_v27  ;;  %v251_v38 = vrot.slane %v250_v31, 4  ;;  %v246_v43 = vrot.slane %v245_v34, 2 }
  0x18   :  { %v232_v49 = vrot.slane %v231_v32, 2  ;;  %v238_v50 = vadd.f32 %v237_v33, %v236_v25  ;;  %v452_v13 = vcombine.high %v448_v3, %v448_v3  ;;  %v311_v14 = vsel %vm285_vm5, %v448_v3, 0.0 }
  0x19   :  { %v92_v30 = vmul.f32 %v88_v24, %v41_v6  ;;  %v93_v35 = vmul.f32 %v89_v29, %v42_v7  ;;  %v252_v48 = vadd.f32 %v251_v38, %v250_v31  ;;  %v247_v57 = vadd.f32 %v246_v43, %v245_v34 }
  0x1a   :  { %v233_v55 = vadd.f32 %v232_v49, %v231_v32  ;;  %v239_v56 = vrot.slane %v238_v50, 2  ;;  %v312_v24 = vsel %vm285_vm5, %v452_v13, 0.0 }
  0x1b   :  { %v96_v36 = vcombine.high %v92_v30, %v92_v30  ;;  %v101_v37 = vsel %vm100_vm0, %v92_v30, 0.0  ;;  %v97_v40 = vcombine.high %v93_v35, %v93_v35  ;;  %v115_v42 = vsel %vm100_vm0, %v93_v35, 0.0 }
  0x1c   :  { %v102_v39 = vrot.slane %v101_v37, 4  ;;  %v116_v46 = vrot.slane %v115_v42, 4  ;;  %v234_v62 = vrot.slane %v233_v55, 1  ;;  %v240_v63 = vadd.f32 %v239_v56, %v238_v50 }
  0x1d   :  { %v108_v41 = vsel %vm100_vm0, %v96_v36, 0.0  ;;  %v122_v47 = vsel %vm100_vm0, %v97_v40, 0.0  ;;  %v253_v0 = vrot.slane %v252_v48, 2  ;;  %v248_v7 = vrot.slane %v247_v57, 1 }
  0x1e   :  { %v103_v44 = vadd.f32 %v102_v39, %v101_v37  ;;  %v109_v45 = vrot.slane %v108_v41, 4  ;;  %v117_v53 = vadd.f32 %v116_v46, %v115_v42  ;;  %v123_v54 = vrot.slane %v122_v47, 4 }
  0x1f   :  { %v241_v6 = vrot.slane %v240_v63, 1  ;;  %v254_v8 = vadd.f32 %v253_v0, %v252_v48  ;;  %v235_v15 = vadd.f32 %v234_v62, %v233_v55  ;;  %v249_v28 = vadd.f32 %v248_v7, %v247_v57 }
  0x20   :  { %v104_v51 = vrot.slane %v103_v44, 2  ;;  %v110_v52 = vadd.f32 %v109_v45, %v108_v41  ;;  %v118_v60 = vrot.slane %v117_v53, 2  ;;  %v124_v61 = vadd.f32 %v123_v54, %v122_v47 }
  0x21   :  { %v255_v16 = vrot.slane %v254_v8, 1  ;;  %v242_v25 = vadd.f32 %v241_v6, %v240_v63  ;;  %v313_v38 = vadd.f32 %v312_v24, %v311_v14  ;;  %v204_v45 = vrot.slane %v452_v13, 1 }
  0x22   :  { %v105_v58 = vadd.f32 %v104_v51, %v103_v44  ;;  %v111_v59 = vrot.slane %v110_v52, 2  ;;  %v119_v1 = vadd.f32 %v118_v60, %v117_v53  ;;  %v125_v2 = vrot.slane %v124_v61, 2 }
  0x23   :  { %v256_v33 = vadd.f32 %v255_v16, %v254_v8  ;;  %v203_v44 = vrot.slane %v448_v3, 1 }
  0x24   :  { %v106_v4 = vrot.slane %v105_v58, 1  ;;  %v112_v5 = vadd.f32 %v111_v59, %v110_v52  ;;  %v120_v11 = vrot.slane %v119_v1, 1  ;;  %v126_v12 = vadd.f32 %v125_v2, %v124_v61 }
  0x26   :  { %v107_v9 = vadd.f32 %v106_v4, %v105_v58  ;;  %v113_v10 = vrot.slane %v112_v5, 1  ;;  %v121_v18 = vadd.f32 %v120_v11, %v119_v1  ;;  %v127_v19 = vrot.slane %v126_v12, 1 }
  0x28   :  { %v114_v17 = vadd.f32 %v113_v10, %v112_v5  ;;  %v456_v23 = vadd.f32 1e-06, %v107_v9  ;;  %v257_v29 = vmul.f32 2.0, %v107_v9  ;;  %v128_v30 = vadd.f32 %v127_v19, %v126_v12 }
  0x29   :  { %v462_v32 = vadd.f32 1e-06, %v121_v18  ;;  %v259_v35 = vmul.f32 2.0, %v121_v18 }
  0x2a   :  { %v460_v31 = vadd.f32 1e-06, %v114_v17  ;;  %345 = vlog2.f32 %v456_v23  ;;  %v258_v34 = vmul.f32 2.0, %v114_v17  ;;  %v261_v36 = vsub.f32 %v235_v15, %v257_v29 }
  0x2b   :  { %v465_v37 = vadd.f32 1e-06, %v128_v30  ;;  %v260_v39 = vmul.f32 2.0, %v128_v30  ;;  %v263_v41 = vsub.f32 %v249_v28, %v259_v35 }
  0x2c   :  { %347 = vlog2.f32 %v460_v31  ;;  %v262_v40 = vsub.f32 %v242_v25, %v258_v34  ;;  %v265_v43 = vadd.f32 1.0, %v261_v36 }
  0x2d   :  { %349 = vlog2.f32 %v462_v32  ;;  %v264_v42 = vsub.f32 %v256_v33, %v260_v39  ;;  %v267_v47 = vadd.f32 1.0, %v263_v41 }
  0x2e   :  { %351 = vlog2.f32 %v465_v37  ;;  %v266_v46 = vadd.f32 1.0, %v262_v40  ;;  %314 = vadd.xlane.f32.xlu0 %v313_v38  ;;  %v269_v49 = vmul.f32 %v448_v3, %v265_v43 }
  0x2f   :  { %v268_v48 = vadd.f32 1.0, %v264_v42  ;;  %v271_v51 = vmul.f32 %v267_v47, %v203_v44 }
  0x30   :  { %v270_v50 = vmul.f32 %v266_v46, %v452_v13 }
  0x31   :  { %v272_v52 = vmul.f32 %v268_v48, %v204_v45  ;;  %v295_v53 = vrot.slane %v271_v51, 7 }
  0x33   :  { %v297_v54 = vrot.slane %v272_v52, 7  ;;  %v296_v56 = vsel %vm279_vm7, %v295_v53, %v269_v49 }
  0x34   :  { %v301_v59 = vsel %vm285_vm5, %v296_v56, 0.0 }
  0x35   :  { %v298_v57 = vsel %vm279_vm7, %v297_v54, %v270_v50 }
  0x36   :  { %v302_v60 = vsel %vm285_vm5, %v298_v57, 0.0 }
  0x37   :  { %v346_v55 = vpop.eup %345  ;;  %v482_v62 = vadd.f32 %v302_v60, %v301_v59 }
  0x38   :  { %v171_v58 = vmul.f32 0.6931472, %v346_v55 }
  0x39   :  { %v348_v61 = vpop.eup %347 }
  0x3a   :  { %v350_v63 = vpop.eup %349  ;;  %v173_v20 = vmul.f32 0.6931472, %v348_v61  ;;  %v178_v0 = vsub.f32 0.0, %v171_v58 }
  0x3b   :  { %v352_v1 = vpop.eup %351  ;;  %v175_v2 = vmul.f32 0.6931472, %v350_v63 }
  0x3c   :  { %v177_v4 = vmul.f32 0.6931472, %v352_v1  ;;  %v179_v5 = vsub.f32 0.0, %v173_v20  ;;  %v209_v6 = vmul.f32 %v448_v3, %v178_v0 }
  0x3d   :  { %v180_v7 = vsub.f32 0.0, %v175_v2 }
  0x3e   :  { %v181_v8 = vsub.f32 0.0, %v177_v4  ;;  %v210_v9 = vmul.f32 %v452_v13, %v179_v5 }
  0x3f   :  { %v211_v10 = vmul.f32 %v203_v44, %v180_v7 }
  0x40   :  { %v212_v11 = vmul.f32 %v204_v45, %v181_v8 }
  0x8a   :  { %v132_v12 = vpop.permute.xlu0 %131 }
  0x8b   :  { %v134_v14 = vmul.f32 %v424_v21, %v132_v12  ;;  %v135_v15 = vmul.f32 %v427_v22, %v132_v12  ;;  %v136_v16 = vmul.f32 %v433_v26, %v132_v12  ;;  %v137_v17 = vmul.f32 %v436_v27, %v132_v12 }
  0x8c   :  { %v182_v21 = vsub.f32 1.0, %v456_v23  ;;  %v183_v22 = vsub.f32 1.0, %v460_v31  ;;  %v184_v26 = vsub.f32 1.0, %v462_v32  ;;  %v185_v27 = vsub.f32 1.0, %v465_v37 }
  0x8d   :  { %v138_v18 = vsel %vm100_vm0, %v134_v14, 0.0  ;;  %v145_v19 = vsel %vm100_vm0, %v135_v15, 0.0  ;;  %v152_v3 = vsel %vm100_vm0, %v136_v16, 0.0  ;;  %v159_v24 = vsel %vm100_vm0, %v137_v17, 0.0  ;;  %v273_v16 = vld [vmem:[#allocation2] sm:$0x3] }
  0x8e   :  { %v139_v13 = vrot.slane %v138_v18, 4  ;;  %v146_v25 = vrot.slane %v145_v19, 4  ;;  %v153_v28 = vrot.slane %v152_v3, 4  ;;  %v160_v29 = vrot.slane %v159_v24, 4 }
  0x8f   :  { %v186_v41 = vmax.f32 %v182_v21, 0.0  ;;  %v187_v42 = vmax.f32 %v183_v22, 0.0  ;;  %v188_v43 = vmax.f32 %v184_v26, 0.0  ;;  %v189_v44 = vmax.f32 %v185_v27, 0.0 }
  0x90   :  { %v140_v30 = vadd.f32 %v139_v13, %v138_v18  ;;  %v147_v33 = vadd.f32 %v146_v25, %v145_v19  ;;  %v154_v34 = vadd.f32 %v153_v28, %v152_v3  ;;  %v161_v35 = vadd.f32 %v160_v29, %v159_v24  ;;  %v325_v3 = vld [vmem:[%s516_s4] sm:$0x3] }
  0x91   :  { %v190_v49 = vmul.f32 %v186_v41, %v186_v41  ;;  %v191_v50 = vmul.f32 %v187_v42, %v187_v42  ;;  %v192_v51 = vmul.f32 %v188_v43, %v188_v43  ;;  %v193_v52 = vmul.f32 %v189_v44, %v189_v44 }
  0x92   :  { %v141_v36 = vrot.slane %v140_v30, 2  ;;  %v148_v38 = vrot.slane %v147_v33, 2  ;;  %v155_v39 = vrot.slane %v154_v34, 2  ;;  %v162_v40 = vrot.slane %v161_v35, 2 }
  0x94   :  { %v142_v45 = vadd.f32 %v141_v36, %v140_v30  ;;  %v149_v23 = vadd.f32 %v148_v38, %v147_v33  ;;  %v156_v46 = vadd.f32 %v155_v39, %v154_v34  ;;  %v163_v31 = vadd.f32 %v162_v40, %v161_v35 }
  0x96   :  { %v157_v47 = vrot.slane %v156_v46, 1  ;;  %v164_v32 = vrot.slane %v163_v31, 1  ;;  %v143_v48 = vrot.slane %v142_v45, 1  ;;  %v150_v37 = vrot.slane %v149_v23, 1 }
  0x98   :  { %v144_v53 = vadd.f32 %v143_v48, %v142_v45  ;;  %v151_v54 = vadd.f32 %v150_v37, %v149_v23  ;;  %v158_v55 = vadd.f32 %v157_v47, %v156_v46  ;;  %v165_v56 = vadd.f32 %v164_v32, %v163_v31 }
  0x9a   :  { %v213_v57 = vmul.f32 %v209_v6, %v144_v53  ;;  %v214_v58 = vmul.f32 %v210_v9, %v151_v54  ;;  %v215_v59 = vmul.f32 %v211_v10, %v158_v55  ;;  %v216_v60 = vmul.f32 %v212_v11, %v165_v56  ;;  %v310_v6 = vld [vmem:[#allocation3] sm:$0x3] }
  0x9c   :  { %v217_v61 = vmul.f32 %v213_v57, %v190_v49  ;;  %v218_v63 = vmul.f32 %v214_v58, %v191_v50  ;;  %v219_v20 = vmul.f32 %v215_v59, %v192_v51  ;;  %v220_v0 = vmul.f32 %v216_v60, %v193_v52 }
  0x9e   :  { %v278_v1 = vrot.slane %v219_v20, 7  ;;  %v281_v2 = vrot.slane %v220_v0, 7 }
  0xa0   :  { %v280_v4 = vsel %vm279_vm7, %v278_v1, %v217_v61  ;;  %v282_v5 = vsel %vm279_vm7, %v281_v2, %v218_v63 }
  0xa1   :  { %v286_v7 = vsel %vm285_vm5, %v280_v4, 0.0  ;;  %v287_v8 = vsel %vm285_vm5, %v282_v5, 0.0 }
  0xa2   :  { %v288_v12 = vadd.f32 %v287_v8, %v286_v7 }
  0xa4   :  { %289 = vadd.xlane.f32.xlu1 %v288_v12 }
  0xa8   :  { %304 = vadd.xlane.f32.xlu1 %v482_v62 }
  0xb7   :  { %v315_v9 = vpop.xlane.xlu0 %314 }
  0xb8   :  { %v316_v10 = vadd.f32 %v315_v9, %v310_v6 }
  0xba   :  { %317 = vst.msk [vmem:[#allocation3] sm:$0x3] %vm38_vm6, %v316_v10 }
  0xc1   :  { %v322_v11 = vld [vmem:[#allocation3] sm:$0x3] }
  0xc2   :  { %353 = vrcp.f32 %v322_v11 }
  0xcf   :  { %v354_v19 = vpop.eup %353 }
 0x12d   :  { %v290_v14 = vpop.xlane.xlu1 %289 }
 0x131   :  { %v305_v15 = vpop.xlane.xlu1 %304 }
 0x132   :  { %v306_v17 = vadd.f32 %v305_v15, %v290_v14 }
 0x134   :  { %v307_v18 = vadd.f32 %v306_v17, %v273_v16 }
 0x136   :  { %309 = vst.msk [vmem:[#allocation2] sm:$0x3] %vm38_vm6, %v307_v18 }
 0x13d   :  { %v321_v62 = vld [vmem:[#allocation2] sm:$0x3] }
 0x13e   :  { %v324_v24 = vmul.f32 %v354_v19, %v321_v62 }
 0x140   :  { %v326_v13 = vmul.f32 %v325_v3, %v324_v24 }
 0x142   :  { %327 = vst.msk [vmem:[%s517_s5] sm:$0x3] %vm38_vm6, %v326_v13 }
 0x143   :  { %332 = vsyncpa [#allocation5], 1 }

</bundles_post_ra>
